<compile_context>
chip_gen: v7x
topology: tpu7x:2x2x1
jax: 0.10.0
libtpu: 0.0.40
codegen_flags: <defaults>
</compile_context>

<pallas_src>
import jax
import jax.numpy as jnp
from jax.experimental import pallas as pl
from jax.experimental.pallas import tpu as pltpu


def _policy_kernel(xT_ref, w1_ref, b1_ref, w2_ref, b2_ref, o_ref):
    xT = xT_ref[...]                     # (4, TB)   batch on lanes
    w1 = w1_ref[...]                     # (H, 4)    PyTorch layout

    # Layer 1 on the VPU: unroll the K=4 contraction as broadcast multiply-adds.
    #   h[j, b] = sum_k w1[j, k] * xT[k, b] + b1[j]
    h = (w1[:, 0:1] * xT[0:1, :]
         + w1[:, 1:2] * xT[1:2, :]
         + w1[:, 2:3] * xT[2:3, :]
         + w1[:, 3:4] * xT[3:4, :]) + b1_ref[...]          # (H, TB)
    h = jnp.maximum(h, 0.0)                                 # ReLU

    # Layer 2 on the MXU: lane-dense N = TB, full K = H contraction.
    logits = jnp.dot(w2_ref[...], h,
                     preferred_element_type=jnp.float32) + b2_ref[...]   # (2, TB)

    # Two-class softmax, closed form: pure elementwise (VPU) + exp/recip (EUP).
    l0 = logits[0:1, :]
    l1 = logits[1:2, :]
    m = jnp.maximum(l0, l1)
    e0 = jnp.exp(l0 - m)
    e1 = jnp.exp(l1 - m)
    inv = pl.reciprocal(e0 + e1)          # exact reciprocal (approx=False default)
    o_ref[...] = jnp.concatenate([e0 * inv, e1 * inv], axis=0)   # (2, TB)


def nn_policy_forward(x, w1, b1, w2, b2, *, tb=512):
    """Forward pass of NNPolicy.

    Args:
      x:  (B, 4) observations (or (4,) for a single observation).
      w1: (H, 4)  l1.weight   b1: (H,)  l1.bias
      w2: (2, H)  l2.weight   b2: (2,)  l2.bias
      tb: batch-tile width (lanes per grid step) for large B; multiple of 128.

    Returns:
      (B, 2) float32 action probabilities (softmax over dim=1).
    """
    x = jnp.asarray(x, jnp.float32)
    if x.ndim == 1:                       # mimic PyTorch unsqueeze(0) for a single obs
        x = x[None, :]
    if x.ndim != 2 or x.shape[1] != 4:
        raise ValueError(f"expected observations of shape (B, 4), got {x.shape}")

    B = x.shape[0]
    H = w1.shape[0]

    # Flip to (features, batch): batch on the lane axis.
    xT = x.T                                                  # (4, B)
    w1 = jnp.asarray(w1, jnp.float32)                         # (H, 4)
    b1c = jnp.reshape(jnp.asarray(b1, jnp.float32), (H, 1))   # (H, 1) lane-broadcast
    w2 = jnp.asarray(w2, jnp.float32)                         # (2, H)
    b2c = jnp.reshape(jnp.asarray(b2, jnp.float32), (2, 1))   # (2, 1) lane-broadcast

    if B <= tb:
        TB = B                 # single block == full array (satisfies block rules)
        B_pad = B
    else:
        TB = tb                # multiple of 128 -> lane-aligned tiles
        B_pad = ((B + TB - 1) // TB) * TB
        if B_pad != B:
            xT = jnp.pad(xT, ((0, 0), (0, B_pad - B)))
    grid = (B_pad // TB,)

    outT = pl.pallas_call(
        _policy_kernel,
        out_shape=jax.ShapeDtypeStruct((2, B_pad), jnp.float32),
        grid=grid,
        in_specs=[
            pl.BlockSpec((4, TB), lambda i: (0, i)),   # x tile, indexed by batch grid
            pl.BlockSpec((H, 4), lambda i: (0, 0)),    # weights stay VMEM-resident
            pl.BlockSpec((H, 1), lambda i: (0, 0)),
            pl.BlockSpec((2, H), lambda i: (0, 0)),
            pl.BlockSpec((2, 1), lambda i: (0, 0)),
        ],
        out_specs=pl.BlockSpec((2, TB), lambda i: (0, i)),     # lane-dense output tile
        compiler_params=pltpu.CompilerParams(
            dimension_semantics=("parallel",)),                # v7x: shard across 2 TCs
    )(xT, w1, b1c, w2, b2c)

    return outT[:, :B].T                                       # (B, 2)


def init_params(key, num_hidden=128):
    """Deterministic init mimicking PyTorch nn.Linear default (uniform +/- 1/sqrt(fan_in)).

    Returns weights in native PyTorch layouts: W1 (H, 4), b1 (H,), W2 (2, H), b2 (2,).
    """
    k1, k2, k3, k4 = jax.random.split(key, 4)
    bound1 = 1.0 / jnp.sqrt(4.0)
    bound2 = 1.0 / jnp.sqrt(float(num_hidden))
    w1 = jax.random.uniform(k1, (num_hidden, 4), jnp.float32, -bound1, bound1)
    b1 = jax.random.uniform(k2, (num_hidden,), jnp.float32, -bound1, bound1)
    w2 = jax.random.uniform(k3, (2, num_hidden), jnp.float32, -bound2, bound2)
    b2 = jax.random.uniform(k4, (2,), jnp.float32, -bound2, bound2)
    return w1, b1, w2, b2


def _reference_forward(x, w1, b1, w2, b2):
    h = jnp.maximum(x @ w1.T + b1, 0.0)
    logits = h @ w2.T + b2
    return jax.nn.softmax(logits, axis=1)


if __name__ == "__main__":
    key = jax.random.PRNGKey(0)
    kx, kp = jax.random.split(key)

    # Small CartPole-like case: (B=8, obs_dim=4), num_hidden=128.
    batch = 8
    num_hidden = 128
    x = jax.random.normal(kx, (batch, 4), jnp.float32)
    w1, b1, w2, b2 = init_params(kp, num_hidden)

    probs = nn_policy_forward(x, w1, b1, w2, b2)
    probs = jax.block_until_ready(probs)

    ref = _reference_forward(x, w1, b1, w2, b2)
    assert probs.shape == (batch, 2)
    assert jnp.allclose(probs, ref, atol=1e-5, rtol=1e-5)
    assert jnp.allclose(jnp.sum(probs, axis=1), jnp.ones((batch,)), atol=1e-5)

    # Exercise the tiled large-batch path (grid over batch, padded to the tile width).
    xb = jax.random.normal(jax.random.PRNGKey(1), (1061, 4), jnp.float32)
    pb = jax.block_until_ready(nn_policy_forward(xb, w1, b1, w2, b2))
    refb = _reference_forward(xb, w1, b1, w2, b2)
    assert pb.shape == (1061, 2)
    assert jnp.allclose(pb, refb, atol=1e-5, rtol=1e-5)

    print("KERNEL_OK")
</pallas_src>

<mosaic_0001>
module attributes {stable_mosaic.version = 11 : i64} {
  func.func @_policy_kernel(%arg0: i32, %arg1: memref<4x8xf32, #tpu.memory_space<vmem>>, %arg2: memref<128x4xf32, #tpu.memory_space<vmem>>, %arg3: memref<128x1xf32, #tpu.memory_space<vmem>>, %arg4: memref<2x128xf32, #tpu.memory_space<vmem>>, %arg5: memref<2x1xf32, #tpu.memory_space<vmem>>, %arg6: memref<2x8xf32, #tpu.memory_space<vmem>>) attributes {dimension_semantics = [#tpu.dimension_semantics<parallel>], iteration_bounds = array<i64: 1>, scalar_prefetch = 0 : i64, scratch_operands = 0 : i64, tpu.core_type = #tpu.core_type<tc>, window_params = [{transform_indices = @transform_0, window_bounds = array<i64: 4, 8>}, {pipeline_mode = #tpu.pipeline_mode<synchronous>, transform_indices = @transform_1, window_bounds = array<i64: 128, 4>}, {pipeline_mode = #tpu.pipeline_mode<synchronous>, transform_indices = @transform_2, window_bounds = array<i64: 128, 1>}, {pipeline_mode = #tpu.pipeline_mode<synchronous>, transform_indices = @transform_3, window_bounds = array<i64: 2, 128>}, {pipeline_mode = #tpu.pipeline_mode<synchronous>, transform_indices = @transform_4, window_bounds = array<i64: 2, 1>}, {transform_indices = @transform_5, window_bounds = array<i64: 2, 8>}]} {
    %c0 = arith.constant 0 : index
    %c0_0 = arith.constant 0 : index
    %0 = vector.load %arg1[%c0, %c0_0] : memref<4x8xf32, #tpu.memory_space<vmem>>, vector<4x8xf32>
    %c0_1 = arith.constant 0 : index
    %c0_2 = arith.constant 0 : index
    %1 = vector.load %arg2[%c0_1, %c0_2] : memref<128x4xf32, #tpu.memory_space<vmem>>, vector<128x4xf32>
    %2 = vector.extract_strided_slice %1 {offsets = [0, 0], sizes = [128, 1], strides = [1, 1]} : vector<128x4xf32> to vector<128x1xf32>
    %3 = vector.extract_strided_slice %0 {offsets = [0, 0], sizes = [1, 8], strides = [1, 1]} : vector<4x8xf32> to vector<1x8xf32>
    %4 = vector.broadcast %2 : vector<128x1xf32> to vector<128x8xf32>
    %5 = vector.broadcast %3 : vector<1x8xf32> to vector<128x8xf32>
    %6 = arith.mulf %4, %5 : vector<128x8xf32>
    %7 = vector.extract_strided_slice %1 {offsets = [0, 1], sizes = [128, 1], strides = [1, 1]} : vector<128x4xf32> to vector<128x1xf32>
    %8 = vector.extract_strided_slice %0 {offsets = [1, 0], sizes = [1, 8], strides = [1, 1]} : vector<4x8xf32> to vector<1x8xf32>
    %9 = vector.broadcast %7 : vector<128x1xf32> to vector<128x8xf32>
    %10 = vector.broadcast %8 : vector<1x8xf32> to vector<128x8xf32>
    %11 = arith.mulf %9, %10 : vector<128x8xf32>
    %12 = arith.addf %6, %11 : vector<128x8xf32>
    %13 = vector.extract_strided_slice %1 {offsets = [0, 2], sizes = [128, 1], strides = [1, 1]} : vector<128x4xf32> to vector<128x1xf32>
    %14 = vector.extract_strided_slice %0 {offsets = [2, 0], sizes = [1, 8], strides = [1, 1]} : vector<4x8xf32> to vector<1x8xf32>
    %15 = vector.broadcast %13 : vector<128x1xf32> to vector<128x8xf32>
    %16 = vector.broadcast %14 : vector<1x8xf32> to vector<128x8xf32>
    %17 = arith.mulf %15, %16 : vector<128x8xf32>
    %18 = arith.addf %12, %17 : vector<128x8xf32>
    %19 = vector.extract_strided_slice %1 {offsets = [0, 3], sizes = [128, 1], strides = [1, 1]} : vector<128x4xf32> to vector<128x1xf32>
    %20 = vector.extract_strided_slice %0 {offsets = [3, 0], sizes = [1, 8], strides = [1, 1]} : vector<4x8xf32> to vector<1x8xf32>
    %21 = vector.broadcast %19 : vector<128x1xf32> to vector<128x8xf32>
    %22 = vector.broadcast %20 : vector<1x8xf32> to vector<128x8xf32>
    %23 = arith.mulf %21, %22 : vector<128x8xf32>
    %24 = arith.addf %18, %23 : vector<128x8xf32>
    %c0_3 = arith.constant 0 : index
    %c0_4 = arith.constant 0 : index
    %25 = vector.load %arg3[%c0_3, %c0_4] : memref<128x1xf32, #tpu.memory_space<vmem>>, vector<128x1xf32>
    %26 = vector.broadcast %25 : vector<128x1xf32> to vector<128x8xf32>
    %27 = arith.addf %24, %26 : vector<128x8xf32>
    %cst = arith.constant 0.000000e+00 : f32
    %28 = vector.broadcast %cst : f32 to vector<128x8xf32>
    %29 = arith.maximumf %27, %28 : vector<128x8xf32>
    %c0_5 = arith.constant 0 : index
    %c0_6 = arith.constant 0 : index
    %30 = vector.load %arg4[%c0_5, %c0_6] : memref<2x128xf32, #tpu.memory_space<vmem>>, vector<2x128xf32>
    %cst_7 = arith.constant dense<0.000000e+00> : vector<2x8xf32>
    %31 = tpu.matmul %30, %29, %cst_7 {dimension_numbers = #tpu.dot_dimension_numbers<[1], [0], [0], [1], [0, 0, 1, 1], [], []>} : vector<2x128xf32>, vector<128x8xf32>, vector<2x8xf32> -> vector<2x8xf32>
    %c0_8 = arith.constant 0 : index
    %c0_9 = arith.constant 0 : index
    %32 = vector.load %arg5[%c0_8, %c0_9] : memref<2x1xf32, #tpu.memory_space<vmem>>, vector<2x1xf32>
    %33 = vector.broadcast %32 : vector<2x1xf32> to vector<2x8xf32>
    %34 = arith.addf %31, %33 : vector<2x8xf32>
    %35 = vector.extract_strided_slice %34 {offsets = [0, 0], sizes = [1, 8], strides = [1, 1]} : vector<2x8xf32> to vector<1x8xf32>
    %36 = vector.extract_strided_slice %34 {offsets = [1, 0], sizes = [1, 8], strides = [1, 1]} : vector<2x8xf32> to vector<1x8xf32>
    %37 = arith.maximumf %35, %36 : vector<1x8xf32>
    %38 = arith.subf %35, %37 : vector<1x8xf32>
    %39 = math.exp %38 : vector<1x8xf32>
    %40 = arith.subf %36, %37 : vector<1x8xf32>
    %41 = math.exp %40 : vector<1x8xf32>
    %42 = arith.addf %39, %41 : vector<1x8xf32>
    %43 = tpu.reciprocal %42 : vector<1x8xf32> -> vector<1x8xf32>
    %44 = arith.mulf %39, %43 : vector<1x8xf32>
    %45 = arith.mulf %41, %43 : vector<1x8xf32>
    %46 = tpu.concatenate %44, %45 in 0 : vector<1x8xf32>, vector<1x8xf32> -> vector<2x8xf32>
    %c0_10 = arith.constant 0 : index
    %c0_11 = arith.constant 0 : index
    %47 = vector.load %arg6[%c0_10, %c0_11] : memref<2x8xf32, #tpu.memory_space<vmem>>, vector<2x8xf32>
    tpu.vector_store %arg6[%c0_10, %c0_11], %46 {strides = array<i32>} : memref<2x8xf32, #tpu.memory_space<vmem>>, vector<2x8xf32>,
    return
  }
  func.func @transform_0(%arg0: i32) -> (i32, i32) {
    %c0_i32 = arith.constant 0 : i32
    %c0_i32_0 = arith.constant 0 : i32
    return %c0_i32, %arg0 : i32, i32
  }
  func.func @transform_1(%arg0: i32) -> (i32, i32) {
    %c0_i32 = arith.constant 0 : i32
    %c0_i32_0 = arith.constant 0 : i32
    %c0_i32_1 = arith.constant 0 : i32
    return %c0_i32, %c0_i32_0 : i32, i32
  }
  func.func @transform_2(%arg0: i32) -> (i32, i32) {
    %c0_i32 = arith.constant 0 : i32
    %c0_i32_0 = arith.constant 0 : i32
    %c0_i32_1 = arith.constant 0 : i32
    return %c0_i32, %c0_i32_0 : i32, i32
  }
  func.func @transform_3(%arg0: i32) -> (i32, i32) {
    %c0_i32 = arith.constant 0 : i32
    %c0_i32_0 = arith.constant 0 : i32
    %c0_i32_1 = arith.constant 0 : i32
    return %c0_i32, %c0_i32_0 : i32, i32
  }
  func.func @transform_4(%arg0: i32) -> (i32, i32) {
    %c0_i32 = arith.constant 0 : i32
    %c0_i32_0 = arith.constant 0 : i32
    %c0_i32_1 = arith.constant 0 : i32
    return %c0_i32, %c0_i32_0 : i32, i32
  }
  func.func @transform_5(%arg0: i32) -> (i32, i32) {
    %c0_i32 = arith.constant 0 : i32
    %c0_i32_0 = arith.constant 0 : i32
    return %c0_i32, %arg0 : i32, i32
  }
}

</mosaic_0001>

<bundles_post_ra>
// kernel: tpu_custom_call.1
= control target key start
LH: loop header
LB: loop body
LE: loop exit
PB: predicated region body
PF: predicated region fallthrough
CT: control target
= control target key end

     0   :  { %v840_v2 = vmov 1   ;;  %s1246_s0 = inlined_call_operand.vmem [shape: f32[4,8], index: 0, kind: input, shape index: {}]   ;;  %s1247_s1 = inlined_call_operand.vmem [shape: f32[128,4], index: 1, kind: input, shape index: {}]   ;;  %s1248_s2 = inlined_call_operand.vmem [shape: f32[128,1], index: 2, kind: input, shape index: {}]   ;;  %s1249_s3 = inlined_call_operand.vmem [shape: f32[2,128], index: 3, kind: input, shape index: {}]   ;;  %s1250_s4 = inlined_call_operand.vmem [shape: f32[2,1], index: 4, kind: input, shape index: {}]   ;;  %s1251_s5 = inlined_call_operand.hbm [shape: f32[2,8], index: 5, kind: output, shape index: {}]  }
   0x1   :  { %v26_v0 = vld [vmem:[%s1247_s1 + $0x20] sm:$0xff]  ;;  %775 = vset.pattern.permute.xlu0 %v840_v2  ;;  %768 = vset.pattern.permute.xlu1 %v840_v2  ;;  %v23_v4 = vld [vmem:[%s1247_s1 + $0x8] sm:$0xff] }
   0x2   :  { %v22_v1 = vld [vmem:[%s1247_s1] sm:$0xff]  ;;  %155 = vperm.xlu0 %775, %v26_v0  }
   0x3   :  { %139 = vperm.xlu1 %768, %v22_v1   ;;  %v889_v3 = vld [vmem:[%s1247_s1 + $0x40] sm:$0xff] }
   0x4   :  { %v898_v5 = vld [vmem:[%s1247_s1 + $0x60] sm:$0xff] }
   0x6   :  { %171 = vperm.xlu0 %775, %v889_v3  }
   0x7   :  { %143 = vperm.xlu1 %768, %v23_v4  }
   0x8   :  { %10 = vsyncpa [#allocation3], 0  ;;  %v841_v6 = vmov 2   ;;  %v24_v7 = vld [vmem:[%s1247_s1 + $0x10] sm:$0xff]  ;;  %v842_v8 = vmov 0   ;;  %v25_v9 = vld [vmem:[%s1247_s1 + $0x18] sm:$0xff]  ;;  %v118_v42 = vlaneseq }
   0x9   :  { %v843_v10 = vmov 3   ;;  %v27_v11 = vld [vmem:[%s1247_s1 + $0x28] sm:$0xff]  ;;  %v29_v12 = vld [vmem:[%s1247_s1 + $0x38] sm:$0xff]  ;;  %v438_v14 = vld [vmem:[%s1248_s2] sm:$0xff]  ;;  %v844_v19 = vmov 0.0|0.0   ;;  %vm845_vm0 = vmmov 0  }
   0xa   :  { %187 = vperm.xlu0 %775, %v898_v5   ;;  %v929_v13 = vld [vmem:[%s1247_s1 + $0x58] sm:$0xff]  ;;  %v439_v15 = vld [vmem:[%s1248_s2 + $0x8] sm:$0xff]  ;;  %v943_v16 = vld [vmem:[%s1247_s1 + $0x70] sm:$0xff]  ;;  %736 = vmatprep.subr.bf16.mxu0 %v844_v19  ;;  %v119_v45 = vshrl.u32 %v118_v42, 7  ;;  %vm666_vm1 = vcmask 1040384   ;;  %vm668_vm2 = vcmask 58368  }
   0xb   :  { %769 = vset.pattern.permute.xlu1 %v841_v6  ;;  %v28_v17 = vld [vmem:[%s1247_s1 + $0x30] sm:$0xff]  ;;  %v441_v18 = vld [vmem:[%s1248_s2 + $0x18] sm:$0xff]  ;;  %v31_v23 = vld [vmem:[%s1247_s1 + $0x48] sm:$0xff] }
   0xc   :  { %243 = vperm.xlu1 %769, %v23_v4   ;;  %v440_v20 = vld [vmem:[%s1248_s2 + $0x10] sm:$0xff]  ;;  %v445_v21 = vld [vmem:[%s1248_s2 + $0x38] sm:$0xff]  ;;  %v451_v25 = vld [vmem:[%s1248_s2 + $0x68] sm:$0xff]  ;;  %v204_v48 = vsub.s32 1, %v119_v45  ;;  %v304_v50 = vsub.s32 2, %v119_v45  ;;  %v120_v51 = vsub.s32 0, %v119_v45 }
   0xd   :  { %v972_v22 = vld [vmem:[%s1247_s1 + $0x78] sm:$0xff]  ;;  %v567_v26 = vld [vmem:[%s1250_s4] sm:$0x3]  ;;  %v443_v28 = vld [vmem:[%s1248_s2 + $0x28] sm:$0xff]  ;;  %v404_v59 = vsub.s32 3, %v119_v45 }
   0xe   :  { %796 = vset.pattern.permute.xlu0 %v841_v6  ;;  %v449_v24 = vld [vmem:[%s1248_s2 + $0x58] sm:$0xff]  ;;  %v442_v27 = vld [vmem:[%s1248_s2 + $0x20] sm:$0xff]  ;;  %v32_v31 = vld [vmem:[%s1247_s1 + $0x50] sm:$0xff] }
   0xf   :  { %239 = vperm.xlu0 %796, %v22_v1   ;;  %v444_v41 = vld [vmem:[%s1248_s2 + $0x30] sm:$0xff]  ;;  %v21_v49 = vld [vmem:[%s1246_s0] sm:$0xf]  ;;  %v1047_v55 = vld [vmem:[%s1247_s1 + $0x68] sm:$0xff] }
  0x10   :  { %770 = vset.pattern.permute.xlu1 %v842_v8  ;;  %v1042_v54 = vrot.slane %v21_v49, %v204_v48  ;;  %v1050_v57 = vrot.slane %v21_v49, %v304_v50  ;;  %v1052_v58 = vrot.slane %v21_v49, %v120_v51 }
  0x11   :  { %50 = vperm.xlu1 %770, %v24_v7  }
  0x13   :  { %251 = vperm.xlu0 %796, %v25_v9  }
  0x15   :  { %771 = vset.pattern.permute.xlu1 %v840_v2 }
  0x16   :  { %147 = vperm.xlu1 %771, %v24_v7  }
  0x17   :  { %255 = vperm.xlu0 %796, %v26_v0  }
  0x1a   :  { %151 = vperm.xlu1 %771, %v25_v9  }
  0x1b   :  { %271 = vperm.xlu0 %796, %v889_v3  }
  0x1e   :  { %772 = vset.pattern.permute.xlu1 %v843_v10 }
  0x1f   :  { %343 = vperm.xlu1 %772, %v23_v4   ;;  %287 = vperm.xlu0 %796, %v898_v5  }
  0x23   :  { %773 = vset.pattern.permute.xlu1 %v841_v6  ;;  %800 = vset.pattern.permute.xlu0 %v843_v10 }
  0x24   :  { %247 = vperm.xlu1 %773, %v24_v7   ;;  %339 = vperm.xlu0 %800, %v22_v1  }
  0x28   :  { %774 = vset.pattern.permute.xlu1 %v842_v8  ;;  %351 = vperm.xlu0 %800, %v25_v9  }
  0x29   :  { %60 = vperm.xlu1 %774, %v26_v0  }
  0x2c   :  { %355 = vperm.xlu0 %800, %v26_v0   ;;  %v1060_v0 = vrot.slane %v21_v49, %v404_v59 }
  0x2d   :  { %65 = vperm.xlu1 %774, %v27_v11  }
  0x30   :  { %367 = vperm.xlu0 %800, %v29_v12  }
  0x31   :  { %776 = vset.pattern.permute.xlu1 %v840_v2 }
  0x32   :  { %159 = vperm.xlu1 %776, %v27_v11  }
  0x34   :  { %371 = vperm.xlu0 %800, %v889_v3  }
  0x36   :  { %777 = vset.pattern.permute.xlu1 %v843_v10 }
  0x37   :  { %347 = vperm.xlu1 %777, %v24_v7  }
  0x38   :  { %383 = vperm.xlu0 %800, %v929_v13  }
  0x3b   :  { %778 = vset.pattern.permute.xlu1 %v842_v8 }
  0x3c   :  { %456 = vperm.xlu1 %778, %v438_v14   ;;  %387 = vperm.xlu0 %800, %v898_v5   ;;  %v446_v14 = vld [vmem:[%s1248_s2 + $0x40] sm:$0xff] }
  0x40   :  { %461 = vperm.xlu1 %778, %v439_v15   ;;  %395 = vperm.xlu0 %800, %v943_v16  }
  0x44   :  { %779 = vset.pattern.permute.xlu1 %v841_v6  ;;  %807 = vset.pattern.permute.xlu0 %v842_v8 }
  0x45   :  { %259 = vperm.xlu1 %779, %v27_v11   ;;  %40 = vperm.xlu0 %807, %v22_v1  }
  0x49   :  { %780 = vset.pattern.permute.xlu1 %v842_v8  ;;  %45 = vperm.xlu0 %807, %v23_v4  }
  0x4a   :  { %70 = vperm.xlu1 %780, %v28_v17  }
  0x4d   :  { %55 = vperm.xlu0 %807, %v25_v9  }
  0x4e   :  { %781 = vset.pattern.permute.xlu1 %v840_v2 }
  0x4f   :  { %163 = vperm.xlu1 %781, %v28_v17  }
  0x51   :  { %75 = vperm.xlu0 %807, %v29_v12  }
  0x53   :  { %167 = vperm.xlu1 %781, %v29_v12  }
  0x55   :  { %471 = vperm.xlu0 %807, %v441_v18   ;;  %v447_v18 = vld [vmem:[%s1248_s2 + $0x48] sm:$0xff] }
  0x57   :  { %782 = vset.pattern.permute.xlu1 %v843_v10 }
  0x58   :  { %359 = vperm.xlu1 %782, %v27_v11  }
  0x59   :  { %80 = vperm.xlu0 %807, %v889_v3  }
  0x5c   :  { %783 = vset.pattern.permute.xlu1 %v842_v8 }
  0x5d   :  { %466 = vperm.xlu1 %783, %v440_v20   ;;  %95 = vperm.xlu0 %807, %v929_v13  }
  0x61   :  { %784 = vset.pattern.permute.xlu1 %v841_v6  ;;  %491 = vperm.xlu0 %807, %v445_v21  }
  0x62   :  { %263 = vperm.xlu1 %784, %v28_v17  }
  0x65   :  { %100 = vperm.xlu0 %807, %v898_v5  }
  0x66   :  { %267 = vperm.xlu1 %784, %v29_v12  }
  0x69   :  { %115 = vperm.xlu0 %807, %v972_v22  }
  0x6a   :  { %785 = vset.pattern.permute.xlu1 %v842_v8 }
  0x6b   :  { %85 = vperm.xlu1 %785, %v31_v23  }
  0x6d   :  { %511 = vperm.xlu0 %807, %v449_v24  }
  0x6f   :  { %786 = vset.pattern.permute.xlu1 %v840_v2 }
  0x70   :  { %175 = vperm.xlu1 %786, %v31_v23  }
  0x71   :  { %521 = vperm.xlu0 %807, %v451_v25  }
  0x74   :  { %787 = vset.pattern.permute.xlu1 %v843_v10 }
  0x75   :  { %363 = vperm.xlu1 %787, %v28_v17   ;;  %570 = vperm.xlu0 %807, %v567_v26  }
  0x79   :  { %788 = vset.pattern.permute.xlu1 %v842_v8 }
  0x7a   :  { %476 = vperm.xlu1 %788, %v442_v27  }
  0x7e   :  { %481 = vperm.xlu1 %788, %v443_v28  }
  0x81   :  { %v156_v30 = vpop.permute.xlu0 %155 }
  0x82   :  { %789 = vset.pattern.permute.xlu1 %v841_v6  ;;  %v998_v29 = vpop.permute.xlu1 %139  ;;  %v210_v56 = vmul.f32 %v1042_v54, %v156_v30 }
  0x83   :  { %275 = vperm.xlu1 %789, %v31_v23   ;;  %v206_v27 = vmul.f32 %v1042_v54, %v998_v29 }
  0x85   :  { %v1005_v33 = vpop.permute.xlu0 %171 }
  0x86   :  { %v1003_v32 = vpop.permute.xlu1 %143 }
  0x87   :  { %790 = vset.pattern.permute.xlu1 %v842_v8  ;;  %v207_v45 = vmul.f32 %v1042_v54, %v1003_v32 }
  0x88   :  { %90 = vperm.xlu1 %790, %v32_v31  }
  0x89   :  { %v1008_v34 = vpop.permute.xlu0 %187 }
  0x8b   :  { %v1010_v35 = vpop.permute.xlu1 %243 }
  0x8c   :  { %791 = vset.pattern.permute.xlu1 %v840_v2  ;;  %v307_v29 = vmul.f32 %v1050_v57, %v1010_v35 }
  0x8d   :  { %179 = vperm.xlu1 %791, %v32_v31  }
  0x8e   :  { %v1013_v36 = vpop.permute.xlu0 %239 }
  0x8f   :  { %v306_v28 = vmul.f32 %v1050_v57, %v1013_v36 }
  0x90   :  { %v1015_v37 = vpop.permute.xlu1 %50 }
  0x91   :  { %183 = vperm.xlu1 %791, %v929_v13  }
  0x92   :  { %v1018_v38 = vpop.permute.xlu0 %251 }
  0x95   :  { %792 = vset.pattern.permute.xlu1 %v843_v10  ;;  %v1021_v39 = vpop.permute.xlu1 %147 }
  0x96   :  { %375 = vperm.xlu1 %792, %v31_v23   ;;  %v256_v40 = vpop.permute.xlu0 %255 }
  0x97   :  { %v310_v62 = vmul.f32 %v1050_v57, %v256_v40 }
  0x99   :  { %v1026_v43 = vpop.permute.xlu1 %151 }
  0x9a   :  { %793 = vset.pattern.permute.xlu1 %v842_v8  ;;  %v1029_v44 = vpop.permute.xlu0 %271 }
  0x9b   :  { %486 = vperm.xlu1 %793, %v444_v41  }
  0x9e   :  { %v1031_v46 = vpop.permute.xlu1 %343  ;;  %v1034_v47 = vpop.permute.xlu0 %287 }
  0x9f   :  { %794 = vset.pattern.permute.xlu1 %v841_v6 }
  0xa0   :  { %279 = vperm.xlu1 %794, %v32_v31  }
  0xa3   :  { %v1039_v52 = vpop.permute.xlu1 %247  ;;  %v340_v53 = vpop.permute.xlu0 %339 }
  0xa4   :  { %283 = vperm.xlu1 %794, %v929_v13  }
  0xa7   :  { %v1054_v60 = vpop.permute.xlu0 %351 }
  0xa8   :  { %795 = vset.pattern.permute.xlu1 %v842_v8  ;;  %v61_v61 = vpop.permute.xlu1 %60 }
  0xa9   :  { %v126_v63 = vmul.f32 %v1052_v58, %v61_v61  ;;  %105 = vperm.xlu1 %795, %v1047_v55  }
  0xab   :  { %v226_v1 = vadd.f32 %v210_v56, %v126_v63  ;;  %v356_v3 = vpop.permute.xlu0 %355  ;;  %v407_v56 = vmul.f32 %v1060_v0, %v1031_v46 }
  0xac   :  { %v1062_v4 = vpop.permute.xlu1 %65  ;;  %v410_v5 = vmul.f32 %v1060_v0, %v356_v3 }
  0xad   :  { %797 = vset.pattern.permute.xlu1 %v840_v2  ;;  %v326_v7 = vadd.f32 %v310_v62, %v226_v1 }
  0xae   :  { %191 = vperm.xlu1 %797, %v1047_v55  }
  0xaf   :  { %v1067_v9 = vadd.f32 %v410_v5, %v326_v7  ;;  %v1069_v11 = vpop.permute.xlu0 %367 }
  0xb1   :  { %v1071_v12 = vpop.permute.xlu1 %159 }
  0xb2   :  { %798 = vset.pattern.permute.xlu1 %v843_v10 }
  0xb3   :  { %379 = vperm.xlu1 %798, %v32_v31   ;;  %v1074_v13 = vpop.permute.xlu0 %371  ;;  %v406_v31 = vmul.f32 %v1060_v0, %v340_v53  ;;  %v209_v53 = vmul.f32 %v1042_v54, %v1026_v43 }
  0xb6   :  { %v348_v15 = vpop.permute.xlu1 %347 }
  0xb7   :  { %799 = vset.pattern.permute.xlu1 %v842_v8  ;;  %v1080_v17 = vpop.permute.xlu0 %383 }
  0xb8   :  { %496 = vperm.xlu1 %799, %v446_v14   ;;  %v208_v14 = vmul.f32 %v1042_v54, %v1021_v39  ;;  %v448_v39 = vld [vmem:[%s1248_s2 + $0x50] sm:$0xff] }
  0xbb   :  { %v457_v20 = vpop.permute.xlu1 %456  ;;  %v1085_v21 = vpop.permute.xlu0 %387 }
  0xbc   :  { %501 = vperm.xlu1 %799, %v447_v18  }
  0xbf   :  { %v462_v23 = vpop.permute.xlu1 %461  ;;  %v1088_v24 = vpop.permute.xlu0 %395 }
  0xc0   :  { %801 = vset.pattern.permute.xlu1 %v841_v6 }
  0xc1   :  { %291 = vperm.xlu1 %801, %v1047_v55  }
  0xc4   :  { %v1091_v25 = vpop.permute.xlu1 %259  ;;  %v41_v26 = vpop.permute.xlu0 %40 }
  0xc5   :  { %802 = vset.pattern.permute.xlu1 %v842_v8  ;;  %v122_v30 = vmul.f32 %v1052_v58, %v41_v26 }
  0xc6   :  { %110 = vperm.xlu1 %802, %v943_v16  }
  0xc7   :  { %v222_v40 = vadd.f32 %v206_v27, %v122_v30  ;;  %v124_v27 = vmul.f32 %v1052_v58, %v1015_v37 }
  0xc8   :  { %v46_v41 = vpop.permute.xlu0 %45 }
  0xc9   :  { %v71_v42 = vpop.permute.xlu1 %70  ;;  %v322_v48 = vadd.f32 %v306_v28, %v222_v40  ;;  %v123_v49 = vmul.f32 %v1052_v58, %v46_v41  ;;  %v308_v28 = vmul.f32 %v1050_v57, %v1039_v52 }
  0xca   :  { %803 = vset.pattern.permute.xlu1 %v840_v2  ;;  %v309_v2 = vmul.f32 %v1050_v57, %v1018_v38  ;;  %v128_v62 = vmul.f32 %v1052_v58, %v71_v42  ;;  %v409_v38 = vmul.f32 %v1060_v0, %v1054_v60  ;;  %v224_v60 = vadd.f32 %v208_v14, %v124_v27  ;;  %v453_v14 = vld [vmem:[%s1248_s2 + $0x78] sm:$0xff] }
  0xcb   :  { %195 = vperm.xlu1 %803, %v943_v16   ;;  %v223_v36 = vadd.f32 %v207_v45, %v123_v49  ;;  %v422_v50 = vadd.f32 %v406_v31, %v322_v48  ;;  %v408_v31 = vmul.f32 %v1060_v0, %v348_v15  ;;  %v314_v42 = vmul.f32 %v1050_v57, %v1029_v44 }
  0xcc   :  { %v56_v51 = vpop.permute.xlu0 %55  ;;  %v324_v37 = vadd.f32 %v308_v28, %v224_v60  ;;  %v414_v49 = vmul.f32 %v1060_v0, %v1074_v13  ;;  %v218_v13 = vmul.f32 %v1042_v54, %v1008_v34  ;;  %v450_v34 = vld [vmem:[%s1248_s2 + $0x60] sm:$0xff] }
  0xcd   :  { %v323_v32 = vadd.f32 %v307_v29, %v223_v36  ;;  %v125_v59 = vmul.f32 %v1052_v58, %v56_v51  ;;  %v534_v3 = vadd.f32 %v457_v20, %v422_v50 }
  0xce   :  { %v164_v61 = vpop.permute.xlu1 %163  ;;  %v424_v15 = vadd.f32 %v408_v31, %v324_v37 }
  0xcf   :  { %v212_v35 = vmul.f32 %v1042_v54, %v164_v61  ;;  %199 = vperm.xlu1 %803, %v972_v22   ;;  %v225_v63 = vadd.f32 %v209_v53, %v125_v59  ;;  %v423_v1 = vadd.f32 %v407_v56, %v323_v32  ;;  %v550_v26 = vmax.f32 %v534_v3, 0.0 }
  0xd0   :  { %v1120_v5 = vpop.permute.xlu0 %75 }
  0xd1   :  { %v1118_v43 = vadd.f32 %v212_v35, %v128_v62  ;;  %v535_v7 = vadd.f32 %v462_v23, %v423_v1  ;;  %v325_v18 = vadd.f32 %v309_v2, %v225_v63  ;;  %v418_v35 = vmul.f32 %v1060_v0, %v1085_v21 }
  0xd2   :  { %v1122_v46 = vpop.permute.xlu1 %167 }
  0xd3   :  { %804 = vset.pattern.permute.xlu1 %v843_v10  ;;  %v551_v20 = vmax.f32 %v535_v7, 0.0  ;;  %v425_v40 = vadd.f32 %v409_v38, %v325_v18 }
  0xd4   :  { %391 = vperm.xlu1 %804, %v1047_v55   ;;  %v472_v23 = vpop.permute.xlu0 %471  ;;  %v214_v55 = vmul.f32 %v1042_v54, %v1005_v33 }
  0xd5   :  { %v737_v30 = vpack.c.bf16 %v551_v20, %v550_v26  ;;  %v537_v48 = vadd.f32 %v472_v23, %v425_v40  ;;  %v127_v26 = vmul.f32 %v1052_v58, %v1062_v4  ;;  %v311_v20 = vmul.f32 %v1050_v57, %v1091_v25 }
  0xd7   :  { %v360_v41 = vpop.permute.xlu1 %359  ;;  %738 = vmatpush3.bf16.msra.mxu0 %v737_v30  ;;  %v553_v53 = vmax.f32 %v537_v48, 0.0 }
  0xd8   :  { %805 = vset.pattern.permute.xlu1 %v842_v8  ;;  %739 = vmatprep.subr.bf16.mxu0 %v844_v19  ;;  %v81_v52 = vpop.permute.xlu0 %80  ;;  %v411_v28 = vmul.f32 %v1060_v0, %v360_v41  ;;  %v129_v41 = vmul.f32 %v1052_v58, %v1120_v5 }
  0xd9   :  { %506 = vperm.xlu1 %805, %v448_v39   ;;  %v130_v45 = vmul.f32 %v1052_v58, %v81_v52  ;;  %v846_v39 = vmov 0.0  }
  0xda   :  { %733 = vmatprep.mubr.msk.f32.mxu0 %vm845_vm0, %v846_v39 }
  0xdb   :  { %v230_v33 = vadd.f32 %v214_v55, %v130_v45 }
  0xdc   :  { %v467_v29 = vpop.permute.xlu1 %466  ;;  %v1148_v50 = vpop.permute.xlu0 %95 }
  0xdd   :  { %v536_v36 = vadd.f32 %v467_v29, %v424_v15  ;;  %806 = vset.pattern.permute.xlu1 %v841_v6  ;;  %v330_v51 = vadd.f32 %v314_v42, %v230_v33  ;;  %v213_v42 = vmul.f32 %v1042_v54, %v1122_v46 }
  0xde   :  { %295 = vperm.xlu1 %806, %v943_v16   ;;  %v318_v16 = vmul.f32 %v1050_v57, %v1034_v47 }
  0xdf   :  { %v552_v56 = vmax.f32 %v536_v36, 0.0  ;;  %v1151_v44 = vadd.f32 %v414_v49, %v330_v51  ;;  %v229_v49 = vadd.f32 %v213_v42, %v129_v41  ;;  %v413_v36 = vmul.f32 %v1060_v0, %v1069_v11 }
  0xe0   :  { %v1153_v61 = vpop.permute.xlu0 %491 }
  0xe1   :  { %v740_v32 = vpack.c.bf16 %v553_v53, %v552_v56  ;;  %v264_v59 = vpop.permute.xlu1 %263 }
  0xe2   :  { %299 = vperm.xlu1 %806, %v972_v22   ;;  %v312_v53 = vmul.f32 %v1050_v57, %v264_v59 }
  0xe3   :  { %741 = vmatpush3.bf16.msra.mxu0 %v740_v32 }
  0xe4   :  { %742 = vmatprep.subr.bf16.mxu0 %v844_v19  ;;  %v101_v2 = vpop.permute.xlu0 %100  ;;  %v328_v32 = vadd.f32 %v312_v53, %v1118_v43 }
  0xe5   :  { %v268_v6 = vpop.permute.xlu1 %267  ;;  %v134_v62 = vmul.f32 %v1052_v58, %v101_v2 }
  0xe6   :  { %808 = vset.pattern.permute.xlu1 %v843_v10  ;;  %v452_v10 = vld [vmem:[%s1248_s2 + $0x70] sm:$0xff] }
  0xe7   :  { %399 = vperm.xlu1 %808, %v972_v22   ;;  %v234_v63 = vadd.f32 %v218_v13, %v134_v62 }
  0xe9   :  { %v334_v3 = vadd.f32 %v318_v16, %v234_v63 }
  0xea   :  { %v86_v1 = vpop.permute.xlu1 %85 }
  0xeb   :  { %809 = vset.pattern.permute.xlu1 %v842_v8  ;;  %v1170_v47 = vadd.f32 %v418_v35, %v334_v3  ;;  %v131_v7 = vmul.f32 %v1052_v58, %v86_v1  ;;  %v211_v8 = vmul.f32 %v1042_v54, %v1071_v12 }
  0xec   :  { %516 = vperm.xlu1 %809, %v450_v34  }
  0xed   :  { %v227_v27 = vadd.f32 %v211_v8, %v127_v26 }
  0xef   :  { %v176_v22 = vpop.permute.xlu1 %175  ;;  %v327_v30 = vadd.f32 %v311_v20, %v227_v27 }
  0xf0   :  { %v215_v21 = vmul.f32 %v1042_v54, %v176_v22  ;;  %526 = vperm.xlu1 %809, %v452_v10  }
  0xf1   :  { %v427_v31 = vadd.f32 %v411_v28, %v327_v30 }
  0xf2   :  { %v231_v38 = vadd.f32 %v215_v21, %v131_v7 }
  0xf4   :  { %531 = vperm.xlu1 %809, %v453_v14   ;;  %v364_v18 = vpop.permute.xlu1 %363 }
  0xf5   :  { %v412_v56 = vmul.f32 %v1060_v0, %v364_v18 }
  0xf9   :  { %v477_v23 = vpop.permute.xlu1 %476 }
  0xfa   :  { %v538_v60 = vadd.f32 %v477_v23, %v1067_v9  ;;  %v313_v9 = vmul.f32 %v1050_v57, %v268_v6  ;;  %v428_v6 = vadd.f32 %v412_v56, %v328_v32  ;;  %v133_v23 = vmul.f32 %v1052_v58, %v1148_v50 }
  0xfc   :  { %v554_v55 = vmax.f32 %v538_v60, 0.0  ;;  %v329_v51 = vadd.f32 %v313_v9, %v229_v49  ;;  %v116_v60 = vpop.permute.xlu0 %115 }
  0xfd   :  { %v482_v12 = vpop.permute.xlu1 %481 }
  0xfe   :  { %v539_v40 = vadd.f32 %v482_v12, %v427_v31  ;;  %v429_v5 = vadd.f32 %v413_v36, %v329_v51 }
 0x100   :  { %v555_v37 = vmax.f32 %v539_v40, 0.0  ;;  %v541_v13 = vadd.f32 %v1153_v61, %v429_v5  ;;  %v417_v40 = vmul.f32 %v1060_v0, %v1080_v17 }
 0x102   :  { %v743_v52 = vpack.c.bf16 %v555_v37, %v554_v55  ;;  %v276_v4 = vpop.permute.xlu1 %275  ;;  %v557_v62 = vmax.f32 %v541_v13, 0.0 }
 0x103   :  { %v315_v10 = vmul.f32 %v1050_v57, %v276_v4 }
 0x104   :  { %744 = vmatpush3.bf16.msra.mxu0 %v743_v52 }
 0x105   :  { %745 = vmatprep.subr.bf16.mxu0 %v844_v19  ;;  %v331_v61 = vadd.f32 %v315_v10, %v231_v38  ;;  %v420_v10 = vmul.f32 %v1060_v0, %v1088_v24 }
 0x107   :  { %v91_v25 = vpop.permute.xlu1 %90 }
 0x108   :  { %v132_v48 = vmul.f32 %v1052_v58, %v91_v25  ;;  %v512_v25 = vpop.permute.xlu0 %511 }
 0x10c   :  { %v180_v45 = vpop.permute.xlu1 %179 }
 0x10d   :  { %v216_v15 = vmul.f32 %v1042_v54, %v180_v45 }
 0x10f   :  { %v232_v29 = vadd.f32 %v216_v15, %v132_v48 }
 0x110   :  { %v184_v33 = vpop.permute.xlu1 %183 }
 0x111   :  { %v217_v30 = vmul.f32 %v1042_v54, %v184_v33 }
 0x115   :  { %v376_v46 = vpop.permute.xlu1 %375 }
 0x116   :  { %v415_v43 = vmul.f32 %v1060_v0, %v376_v46 }
 0x118   :  { %v431_v21 = vadd.f32 %v415_v43, %v331_v61 }
 0x11a   :  { %v487_v2 = vpop.permute.xlu1 %486 }
 0x11b   :  { %v540_v16 = vadd.f32 %v487_v2, %v428_v6 }
 0x11d   :  { %v556_v35 = vmax.f32 %v540_v16, 0.0  ;;  %v522_v16 = vpop.permute.xlu0 %521 }
 0x11f   :  { %v746_v63 = vpack.c.bf16 %v557_v62, %v556_v35  ;;  %v280_v34 = vpop.permute.xlu1 %279 }
 0x120   :  { %v316_v55 = vmul.f32 %v1050_v57, %v280_v34 }
 0x121   :  { %747 = vmatpush3.bf16.msra.mxu0 %v746_v63  ;;  %v571_v24 = vpop.permute.xlu0 %570 }
 0x122   :  { %748 = vmatprep.subr.bf16.mxu0 %v844_v19  ;;  %v332_v50 = vadd.f32 %v316_v55, %v232_v29 }
 0x123   :  { %v284_v11 = vpop.permute.xlu1 %283 }
 0x124   :  { %v317_v38 = vmul.f32 %v1050_v57, %v284_v11  ;;  %v137_v11 = vmul.f32 %v1052_v58, %v116_v60 }
 0x128   :  { %v106_v59 = vpop.permute.xlu1 %105 }
 0x129   :  { %v135_v17 = vmul.f32 %v1052_v58, %v106_v59 }
 0x12d   :  { %v192_v1 = vpop.permute.xlu1 %191 }
 0x12e   :  { %v219_v36 = vmul.f32 %v1042_v54, %v192_v1 }
 0x130   :  { %v235_v5 = vadd.f32 %v219_v36, %v135_v17 }
 0x132   :  { %v380_v3 = vpop.permute.xlu1 %379 }
 0x133   :  { %v416_v52 = vmul.f32 %v1060_v0, %v380_v3 }
 0x135   :  { %v432_v42 = vadd.f32 %v416_v52, %v332_v50 }
 0x137   :  { %v497_v22 = vpop.permute.xlu1 %496 }
 0x138   :  { %v542_v7 = vadd.f32 %v497_v22, %v1151_v44  ;;  %v233_v44 = vadd.f32 %v217_v30, %v133_v23 }
 0x13a   :  { %v558_v18 = vmax.f32 %v542_v7, 0.0  ;;  %v333_v12 = vadd.f32 %v317_v38, %v233_v44 }
 0x13b   :  { %v502_v14 = vpop.permute.xlu1 %501 }
 0x13c   :  { %v543_v8 = vadd.f32 %v502_v14, %v431_v21  ;;  %v433_v37 = vadd.f32 %v417_v40, %v333_v12 }
 0x13e   :  { %v559_v26 = vmax.f32 %v543_v8, 0.0  ;;  %v545_v41 = vadd.f32 %v512_v25, %v433_v37 }
 0x140   :  { %v749_v20 = vpack.c.bf16 %v559_v26, %v558_v18  ;;  %v292_v27 = vpop.permute.xlu1 %291  ;;  %v561_v48 = vmax.f32 %v545_v41, 0.0 }
 0x141   :  { %v319_v51 = vmul.f32 %v1050_v57, %v292_v27 }
 0x142   :  { %750 = vmatpush3.bf16.msra.mxu0 %v749_v20 }
 0x143   :  { %751 = vmatprep.subr.bf16.mxu0 %v844_v19  ;;  %v335_v56 = vadd.f32 %v319_v51, %v235_v5 }
 0x145   :  { %v111_v28 = vpop.permute.xlu1 %110 }
 0x146   :  { %v136_v6 = vmul.f32 %v1052_v58, %v111_v28 }
 0x14a   :  { %v196_v39 = vpop.permute.xlu1 %195 }
 0x14b   :  { %v220_v46 = vmul.f32 %v1042_v54, %v196_v39 }
 0x14d   :  { %v236_v62 = vadd.f32 %v220_v46, %v136_v6 }
 0x14e   :  { %v200_v31 = vpop.permute.xlu1 %199 }
 0x14f   :  { %v221_v35 = vmul.f32 %v1042_v54, %v200_v31 }
 0x151   :  { %v237_v43 = vadd.f32 %v221_v35, %v137_v11 }
 0x153   :  { %v392_v4 = vpop.permute.xlu1 %391 }
 0x154   :  { %v419_v29 = vmul.f32 %v1060_v0, %v392_v4 }
 0x156   :  { %v435_v32 = vadd.f32 %v419_v29, %v335_v56 }
 0x158   :  { %v507_v45 = vpop.permute.xlu1 %506  ;;  %v547_v63 = vadd.f32 %v522_v16, %v435_v32 }
 0x159   :  { %v544_v9 = vadd.f32 %v507_v45, %v432_v42 }
 0x15a   :  { %v563_v7 = vmax.f32 %v547_v63, 0.0 }
 0x15b   :  { %v560_v15 = vmax.f32 %v544_v9, 0.0 }
 0x15d   :  { %v752_v49 = vpack.c.bf16 %v561_v48, %v560_v15  ;;  %v296_v33 = vpop.permute.xlu1 %295 }
 0x15e   :  { %v320_v2 = vmul.f32 %v1050_v57, %v296_v33 }
 0x15f   :  { %753 = vmatpush3.bf16.msra.mxu0 %v752_v49 }
 0x160   :  { %754 = vmatprep.subr.bf16.mxu0 %v844_v19  ;;  %v336_v59 = vadd.f32 %v320_v2, %v236_v62 }
 0x161   :  { %v300_v53 = vpop.permute.xlu1 %299 }
 0x162   :  { %v321_v1 = vmul.f32 %v1050_v57, %v300_v53  ;;  %v436_v8 = vadd.f32 %v420_v10, %v336_v59 }
 0x164   :  { %v337_v14 = vadd.f32 %v321_v1, %v237_v43 }
 0x166   :  { %v400_v13 = vpop.permute.xlu1 %399 }
 0x167   :  { %v421_v22 = vmul.f32 %v1060_v0, %v400_v13  ;;  %v566_v0 = vld [vmem:[%s1249_s3] sm:$0x3]  ;;  %s847_s3 = smov [#allocation2]  }
 0x168   :  { %s676_s9 = sshll.u32 %s847_s3, 4  ;;  %s677_s9 = int_to_ptr.vmem [resolvable:$true] %s676_s9 }
 0x169   :  { %v437_v58 = vadd.f32 %v421_v22, %v337_v14  ;;  %s816_s10 = scalar_lea.vmem %s677_s9, 32  ;;  %p821_p1 = scmp.lt.s32.totalorder %s677_s9, %s677_s9 }
 0x16a   :  { %p817_p0 = scmp.ne.s32.totalorder %s677_s9, %s816_s10  ;;  %p822_p2 = scmp.lt.s32.totalorder %s816_s10, %s816_s10 }
 0x16b   :  { %v517_v34 = vpop.permute.xlu1 %516 }
 0x16c   :  { %v546_v3 = vadd.f32 %v517_v34, %v1170_v47  ;;  %p823_p3 = por %p822_p2, %p821_p1 }
 0x16e   :  { %v562_v61 = vmax.f32 %v546_v3, 0.0  ;;  %p824_p4 = pnand %p823_p3, %p817_p0 }
 0x16f   :  { %v527_v21 = vpop.permute.xlu1 %526 }
 0x170   :  { %v755_v54 = vpack.c.bf16 %v563_v7, %v562_v61  ;;  %v548_v18 = vadd.f32 %v527_v21, %v436_v8 }
 0x172   :  { %756 = vmatpush3.bf16.msra.mxu0 %v755_v54  ;;  %v564_v47 = vmax.f32 %v548_v18, 0.0 }
 0x173   :  { %v532_v26 = vpop.permute.xlu1 %531  ;;  %757 = vmatprep.subr.bf16.mxu0 %v844_v19 }
 0x174   :  { %v549_v57 = vadd.f32 %v532_v26, %v437_v58 }
 0x176   :  { %v565_v20 = vmax.f32 %v549_v57, 0.0 }
 0x178   :  { %v758_v27 = vpack.c.bf16 %v565_v20, %v564_v47 }
 0x17a   :  { %759 = vmatpush3.bf16.msra.mxu0 %v758_v27 }
 0x17d   :  { %734 = vmatmul.mubr.f32.vlgmr.msra.gmra.mrb[0].mxu0 %v566_v0 }
 0x250   :  { %v639_v28 = vpop.f32.mrb[0].mxu0 }
 0x251   :  { %v640_v23 = vadd.f32 %v639_v28, %v571_v24  ;;  %v735_v30 = vpop.f32.mrb[1].mxu0 }
 0x253   :  { %v644_v39 = vrot.slane %v640_v23, 1 }
 0x255   :  { %v646_v38 = vmax.f32 %v640_v23, %v644_v39 }
 0x257   :  { %v647_v44 = vsub.f32 %v640_v23, %v646_v38  ;;  %v651_v60 = vrot.slane %v646_v38, 7 }
 0x259   :  { %v653_v31 = vsub.f32 %v640_v23, %v651_v60  ;;  %v648_v19 = vmul.f32 1.442695, %v647_v44 }
 0x25b   :  { %v654_v12 = vmul.f32 1.442695, %v653_v31 }
 0x25d   :  { %810 = vpow2.f32 %v654_v12 }
 0x25e   :  { %812 = vpow2.f32 %v648_v19 }
 0x267   :  { %v811_v40 = vpop.eup %810 }
 0x268   :  { %v657_v55 = vrot.slane %v811_v40, 1  ;;  %v813_v37 = vpop.eup %812 }
 0x26a   :  { %v659_v52 = vadd.f32 %v813_v37, %v657_v55 }
 0x26c   :  { %814 = vrcp.f32 %v659_v52 }
 0x276   :  { %v815_v4 = vpop.eup %814 }
 0x277   :  { %v663_v25 = vrot.slane %v815_v4, 7  ;;  %v661_v50 = vmul.f32 %v815_v4, %v813_v37 }
 0x279   :  { %v665_v41 = vmul.f32 %v811_v40, %v663_v25 }
 0x27b   :  { %v667_v42 = vsel %vm666_vm1, %v661_v50, %v665_v41 }
 0x27c   :  { %669 = vst.msk [vmem:[#allocation2] sm:$0x3] %vm668_vm2, %v667_v42 }
 0x27d   :  { %827 = shalt.err (!%p824_p4)
}
 0x27e   :  { %s828_s13 = scalar_lea.hbm %s1251_s5, 32 }
 0x27f   :  { %p829_p5 = scmp.ne.s32.totalorder %s1251_s5, %s828_s13  ;;  %p832_p6 = scmp.lt.u32.totalorder %s828_s13, %s1251_s5 }
 0x281   :  { %p834_p7 = pnand %p832_p6, %p829_p5 }
 0x283   :  { %837 = shalt.err (!%p834_p7)
}
 0x284   :  { %679 = dma.vmem_to_hbm [thread:$0]  %s677_s9, 32, %s1251_s5, [#allocation3]  }
 0x285   :  { %838 = dma.done.wait [#allocation3], 32  }
 0x286   :  { %839 = vsyncadd [#allocation3], 4294967264 }
 0x287   :  { %683 = vsyncpa [#allocation3], 1 }

</bundles_post_ra>
